<compile_context>
chip_gen: v7x
topology: tpu7x:2x2x1
jax: 0.10.0
libtpu: 0.0.40
codegen_flags: <defaults>
</compile_context>

<pallas_src>
import math
import functools

import jax
import jax.numpy as jnp
from jax.experimental import pallas as pl
from jax.experimental.pallas import tpu as pltpu


def _round_up(x, m):
    return ((x + m - 1) // m) * m


# ----------------------------- fused attention kernel -----------------------------
def _self_attention_kernel(*refs, n_heads, fused_qkv, has_mask, mxu_dtype, approx_recip):
    # Static unpacking of the ref list (layout depends on fused_qkv / has_mask flags).
    idx = 0
    if fused_qkv:
        x_ref = refs[idx]; idx += 1
        q_ref = k_ref = v_ref = x_ref
    else:
        q_ref, k_ref, v_ref = refs[idx:idx + 3]; idx += 3
    if has_mask:
        mask_ref = refs[idx]; idx += 1
    else:
        mask_ref = None
    wqkv_ref, bqkv_ref, wf_ref, bf_ref, out_ref = refs[idx:idx + 5]

    f32 = jnp.float32
    bN, Lq, H = q_ref.shape
    Lk = k_ref.shape[1]
    hd = H // n_heads
    Hp = wf_ref.shape[1]        # lane-padded fc output width (multiple of 128)

    wqkv = wqkv_ref[...]        # (H, 3H), already mxu_dtype; W_q pre-scaled by 1/sqrt(hd)
    bqkv = bqkv_ref[...]        # (1, 3H) f32; b_q pre-scaled by 1/sqrt(hd)
    wf = wf_ref[...]            # (H, Hp), already mxu_dtype
    bf = bf_ref[...]            # (1, Hp) f32

    # ---- Q/K/V projections -------------------------------------------------------
    if fused_qkv:
        # One (bN*L, H) @ (H, 3H) MXU push + one bias add.
        x2 = x_ref[...].reshape(bN * Lq, H).astype(mxu_dtype)
        qkv = jnp.dot(x2, wqkv, preferred_element_type=f32) + bqkv   # (bN*L, 3H)
        Q = qkv[:, :H].reshape(bN, Lq, H)
        K = qkv[:, H:2 * H].reshape(bN, Lk, H)
        V = qkv[:, 2 * H:].reshape(bN, Lk, H)
    else:
        q2 = q_ref[...].reshape(bN * Lq, H).astype(mxu_dtype)
        k2 = k_ref[...].reshape(bN * Lk, H).astype(mxu_dtype)
        v2 = v_ref[...].reshape(bN * Lk, H).astype(mxu_dtype)
        Q = (jnp.dot(q2, wqkv[:, :H], preferred_element_type=f32)
             + bqkv[:, :H]).reshape(bN, Lq, H)
        K = (jnp.dot(k2, wqkv[:, H:2 * H], preferred_element_type=f32)
             + bqkv[:, H:2 * H]).reshape(bN, Lk, H)
        V = (jnp.dot(v2, wqkv[:, 2 * H:], preferred_element_type=f32)
             + bqkv[:, 2 * H:]).reshape(bN, Lk, H)

    # ---- additive mask bias, computed ONCE (hoisted out of the head loop) ---------
    # keep=1 -> 0, keep=0 -> -1e10.  (For a fully-masked row this differs from
    # masked_fill only in that degenerate case; outputs there are garbage either way.)
    if has_mask:
        neg = (jnp.float32(1.0) - mask_ref[...].astype(f32)) * jnp.float32(-1e10)

    # ---- attention per head (small static loop), logits/softmax in f32 ------------
    head_ctx = []
    for h in range(n_heads):
        lo, hi = h * hd, (h + 1) * hd
        qh = Q[:, :, lo:hi].astype(mxu_dtype)     # (bN, Lq, hd); already scaled via W_q
        kh = K[:, :, lo:hi].astype(mxu_dtype)
        vh = V[:, :, lo:hi].astype(mxu_dtype)

        energy = jnp.einsum('bqd,bkd->bqk', qh, kh,
                            preferred_element_type=f32)              # (bN, Lq, Lk)
        if has_mask:
            energy = energy + neg

        m = jnp.max(energy, axis=-1, keepdims=True)
        e = jnp.exp(energy - m)
        l = jnp.sum(e, axis=-1, keepdims=True)
        # Unnormalized e @ V, then normalize the small (Lq, hd) output (EUP reciprocal).
        oh = jnp.einsum('bqk,bkd->bqd', e.astype(mxu_dtype), vh,
                        preferred_element_type=f32)                  # (bN, Lq, hd)
        oh = oh * pl.reciprocal(l, approx=approx_recip)
        # TODO(synk): nn.Dropout on the attention weights is not applied (eval / p=0 path).
        head_ctx.append(oh)

    # ---- merge heads + single fc matmul -------------------------------------------
    ctx = jnp.concatenate(head_ctx, axis=-1)                          # (bN, Lq, H)
    out = jnp.dot(ctx.reshape(bN * Lq, H).astype(mxu_dtype), wf,
                  preferred_element_type=f32) + bf                    # (bN*Lq, Hp)
    out_ref[...] = out.reshape(bN, Lq, Hp).astype(out_ref.dtype)


# ----------------------------- batch-block sizing ---------------------------------
def _pick_batch_block(N, Lq, Lk, H, Hp, act_bytes, w_bytes, vmem_budget_bytes):
    """Choose batch_block from a VMEM budget; keep >=2 grid steps when N >= 2."""
    per_row = (
        2 * (Lq * H + 2 * Lk * H) * act_bytes     # double-buffered q/k/v input tiles
        + 2 * Lq * Hp * act_bytes                 # double-buffered output tile
        + 2 * Lq * Lk                             # double-buffered int8 mask tile
        + 3 * max(Lq, Lk) * H * 4                 # f32 Q/K/V intermediates
        + 2 * Lq * Lk * 4                         # energy / exp scratch
        + 2 * Lq * max(H, Hp) * 4                 # head outputs + merged context
    )
    weights = 2 * ((3 * H * H + H * Hp) * w_bytes + (3 * H + Hp) * 4)
    avail = max(vmem_budget_bytes - weights, per_row)
    bb = int(max(1, min(N, avail // per_row)))
    if N >= 2:                                    # pipelining + v7x 2nd TensorCore
        bb = min(bb, (N + 1) // 2)
    while N % bb:
        bb -= 1
    return bb


# ----------------------------- wrapper --------------------------------------------
def self_attention(params, query, key, value, mask=None, *, n_heads,
                   mxu_dtype=None, batch_block=None,
                   vmem_budget_bytes=20 * 1024 * 1024):
    """Forward pass of SelfAttention. params holds PyTorch-layout Linear weights."""
    fused_qkv = (query is key) and (key is value)   # true self-attention on one tensor

    query = jnp.asarray(query)
    key = jnp.asarray(key)
    value = jnp.asarray(value)

    N, Lq, H = query.shape
    Lk = key.shape[1]
    assert H % n_heads == 0
    hd = H // n_heads
    inv_scale = 1.0 / math.sqrt(hd)

    act_dtype = query.dtype
    if mxu_dtype is None:
        mxu_dtype = jnp.bfloat16 if act_dtype == jnp.bfloat16 else jnp.float32

    # ---- lane/sublane friendly padding (all sliced off after the call) ------------
    Hp = _round_up(H, 128)                # fc output columns -> dense vector stores
    Lqp = _round_up(Lq, 8)
    Lkp = _round_up(Lk, 8)
    if fused_qkv:
        Lqp = Lkp = max(Lqp, Lkp)

    need_mask = (mask is not None) or (Lkp != Lk)

    if need_mask:
        if mask is None:
            m3 = jnp.ones((N, Lq, Lk), jnp.int8)
        else:
            m = jnp.asarray(mask)
            if m.ndim == 4:               # (N, 1, Lq|1, Lk) — broadcast over heads
                m = m[:, 0]
            elif m.ndim == 2:             # (N, Lk)
                m = m[:, None, :]
            m3 = jnp.broadcast_to(m != 0, (N, Lq, Lk)).astype(jnp.int8)
        if (Lqp != Lq) or (Lkp != Lk):    # padded keys are masked out
            m3 = jnp.pad(m3, ((0, 0), (0, Lqp - Lq), (0, Lkp - Lk)))

    if Lqp != Lq:
        query = jnp.pad(query, ((0, 0), (0, Lqp - Lq), (0, 0)))
    if (not fused_qkv) and Lkp != Lk:
        key = jnp.pad(key, ((0, 0), (0, Lkp - Lk), (0, 0)))
        value = jnp.pad(value, ((0, 0), (0, Lkp - Lk), (0, 0)))

    # ---- weights: PyTorch (out,in) -> (in,out); fuse QKV; fold 1/sqrt(hd) into W_q -
    w_q = jnp.asarray(params["w_q"]["weight"], jnp.float32)
    w_k = jnp.asarray(params["w_k"]["weight"], jnp.float32)
    w_v = jnp.asarray(params["w_v"]["weight"], jnp.float32)
    w_f = jnp.asarray(params["fc"]["weight"], jnp.float32)
    b_q = jnp.asarray(params["w_q"]["bias"], jnp.float32)
    b_k = jnp.asarray(params["w_k"]["bias"], jnp.float32)
    b_v = jnp.asarray(params["w_v"]["bias"], jnp.float32)
    b_f = jnp.asarray(params["fc"]["bias"], jnp.float32)

    wqkv = jnp.concatenate([w_q.T * inv_scale, w_k.T, w_v.T], axis=1)       # (H, 3H)
    bqkv = jnp.concatenate([b_q * inv_scale, b_k, b_v]).reshape(1, 3 * H)   # (1, 3H) f32
    wf = w_f.T                                                              # (H, H)
    bf = b_f.reshape(1, H)
    if Hp != H:                         # zero-pad fc output columns (exact; sliced off)
        wf = jnp.pad(wf, ((0, 0), (0, Hp - H)))
        bf = jnp.pad(bf, ((0, 0), (0, Hp - H)))

    # Cast matmul weights to the MXU dtype OUTSIDE the kernel; biases stay f32.
    wqkv = wqkv.astype(mxu_dtype)
    wf = wf.astype(mxu_dtype)

    # ---- batch tiling from a VMEM budget -------------------------------------------
    act_bytes = jnp.dtype(act_dtype).itemsize
    w_bytes = jnp.dtype(mxu_dtype).itemsize
    if batch_block is None:
        batch_block = _pick_batch_block(N, Lqp, Lkp, H, Hp, act_bytes, w_bytes,
                                        vmem_budget_bytes)
    assert N % batch_block == 0
    nb = N // batch_block

    def batched(tail):
        return pl.BlockSpec((batch_block,) + tail, lambda b: (b, 0, 0))

    def shared(shape):
        return pl.BlockSpec(shape, lambda b: (0, 0))

    inputs, in_specs = [], []
    if fused_qkv:
        inputs.append(query)
        in_specs.append(batched((Lqp, H)))
    else:
        inputs += [query, key, value]
        in_specs += [batched((Lqp, H)), batched((Lkp, H)), batched((Lkp, H))]
    if need_mask:
        inputs.append(m3)
        in_specs.append(batched((Lqp, Lkp)))
    inputs += [wqkv, bqkv, wf, bf]
    in_specs += [shared((H, 3 * H)), shared((1, 3 * H)),
                 shared((H, Hp)), shared((1, Hp))]

    kernel = functools.partial(
        _self_attention_kernel, n_heads=n_heads, fused_qkv=fused_qkv,
        has_mask=need_mask, mxu_dtype=mxu_dtype,
        approx_recip=(mxu_dtype == jnp.bfloat16))

    # Advisory cost estimate so XLA schedules surrounding ops around the call.
    proj_flops = (2 * N * Lqp * H * 3 * H if fused_qkv
                  else 2 * N * (Lqp + 2 * Lkp) * H * H)
    attn_flops = 4 * N * n_heads * Lqp * Lkp * hd
    fc_flops = 2 * N * Lqp * H * Hp
    in_bytes = act_bytes * N * ((Lqp * H) if fused_qkv else (Lqp + 2 * Lkp) * H)
    mask_bytes = N * Lqp * Lkp if need_mask else 0
    weight_bytes = (3 * H * H + H * Hp) * w_bytes + (3 * H + Hp) * 4
    out_bytes = N * Lqp * Hp * act_bytes
    cost = pl.CostEstimate(
        flops=int(proj_flops + attn_flops + fc_flops),
        transcendentals=int(N * n_heads * Lqp * Lkp),
        bytes_accessed=int(in_bytes + mask_bytes + weight_bytes + out_bytes))

    out = pl.pallas_call(
        kernel,
        out_shape=jax.ShapeDtypeStruct((N, Lqp, Hp), act_dtype),
        grid=(nb,),
        in_specs=in_specs,
        out_specs=batched((Lqp, Hp)),
        compiler_params=pltpu.CompilerParams(
            dimension_semantics=("parallel",),         # shardable across v7x's 2 TCs
            vmem_limit_bytes=32 * 1024 * 1024),        # explicit, v7x-safe scoped limit
        cost_estimate=cost,
    )(*inputs)

    if (Lqp != Lq) or (Hp != H):
        out = out[:, :Lq, :H]
    return out


# ----------------------------- params & reference ---------------------------------
def init_self_attention_params(rng, hid_dim):
    def linear(k):
        k1, k2 = jax.random.split(k)
        bound = 1.0 / math.sqrt(hid_dim)
        w = jax.random.uniform(k1, (hid_dim, hid_dim), jnp.float32, -bound, bound)
        b = jax.random.uniform(k2, (hid_dim,), jnp.float32, -bound, bound)
        return {"weight": w, "bias": b}
    ks = jax.random.split(rng, 4)
    return {"w_q": linear(ks[0]), "w_k": linear(ks[1]),
            "w_v": linear(ks[2]), "fc": linear(ks[3])}


def ref_self_attention(params, query, key, value, mask, *, n_heads):
    """Plain-JAX replica of the PyTorch forward (accurate f32 matmuls)."""
    N, Lq, H = query.shape
    Lk = key.shape[1]
    hd = H // n_heads
    scale = math.sqrt(hd)
    hp = "highest"

    def lin(x, p):
        return jnp.einsum("bli,oi->blo", x, p["weight"], precision=hp) + p["bias"]

    Q = lin(query, params["w_q"]).reshape(N, Lq, n_heads, hd).transpose(0, 2, 1, 3)
    K = lin(key, params["w_k"]).reshape(N, Lk, n_heads, hd).transpose(0, 2, 1, 3)
    V = lin(value, params["w_v"]).reshape(N, Lk, n_heads, hd).transpose(0, 2, 1, 3)

    energy = jnp.einsum("bhqd,bhkd->bhqk", Q, K, precision=hp) / scale
    if mask is not None:
        energy = jnp.where(mask == 0, -1e10, energy)
    attn = jax.nn.softmax(energy, axis=-1)
    x = jnp.einsum("bhqk,bhkd->bhqd", attn, V, precision=hp)
    x = x.transpose(0, 2, 1, 3).reshape(N, Lq, H)
    return jnp.einsum("bli,oi->blo", x, params["fc"]["weight"], precision=hp) \
        + params["fc"]["bias"]


# ----------------------------- demo / check ----------------------------------------
if __name__ == "__main__":
    root = jax.random.PRNGKey(0)
    kp, kq, kk, kv = jax.random.split(root, 4)

    N, L, H, n_heads = 2, 8, 32, 4
    params = init_self_attention_params(kp, H)
    x = jax.random.normal(kq, (N, L, H), jnp.float32)
    key_in = jax.random.normal(kk, (N, L, H), jnp.float32)
    value_in = jax.random.normal(kv, (N, L, H), jnp.float32)

    # PyTorch-style broadcastable mask (N, 1, 1, Lk); batch 1 has only 5 valid keys.
    lens = jnp.array([8, 5], dtype=jnp.int32)
    mask = (jnp.arange(L)[None, :] < lens[:, None]).astype(jnp.float32)[:, None, None, :]

    # 1) true self-attention (q=k=v) with mask — fused (H,3H) QKV path, f32 exactness.
    out = self_attention(params, x, x, x, mask, n_heads=n_heads)
    jax.block_until_ready(out)
    ref = ref_self_attention(params, x, x, x, mask, n_heads=n_heads)
    assert out.shape == (N, L, H)
    assert jnp.allclose(out, ref, atol=5e-3, rtol=5e-3), \
        float(jnp.max(jnp.abs(out - ref)))

    # 2) distinct query / key / value (cross-attention layout), f32 exactness.
    out_c = self_attention(params, x, key_in, value_in, mask, n_heads=n_heads)
    ref_c = ref_self_attention(params, x, key_in, value_in, mask, n_heads=n_heads)
    assert jnp.allclose(out_c, ref_c, atol=5e-3, rtol=5e-3)

    # 3) mask=None path (no mask DMA at all).
    out_nm = self_attention(params, x, x, x, None, n_heads=n_heads)
    ref_nm = ref_self_attention(params, x, x, x, None, n_heads=n_heads)
    assert jnp.allclose(out_nm, ref_nm, atol=5e-3, rtol=5e-3)

    # 4) bf16 MXU fast path on f32 activations (v6e/v7x); logits/softmax stay f32.
    out_bf = self_attention(params, x, x, x, mask, n_heads=n_heads,
                            mxu_dtype=jnp.bfloat16)
    jax.block_until_ready(out_bf)
    assert jnp.all(jnp.isfinite(out_bf))
    assert jnp.allclose(out_bf, ref, atol=1e-1, rtol=1e-1)

    # 5) bf16 activations end-to-end (half the HBM/VMEM activation traffic).
    xb = x.astype(jnp.bfloat16)
    out_b16 = self_attention(params, xb, xb, xb, mask, n_heads=n_heads)
    jax.block_until_ready(out_b16)
    assert out_b16.dtype == jnp.bfloat16
    assert float(jnp.max(jnp.abs(out_b16.astype(jnp.float32) - ref))) < 0.25

    print("KERNEL_OK")
</pallas_src>

<mosaic_0001>
module attributes {stable_mosaic.version = 11 : i64} {
  func.func @_self_attention_kernel(%arg0: i32, %arg1: memref<1x8x32xf32, #tpu.memory_space<vmem>>, %arg2: memref<1x8x8xi8, #tpu.memory_space<vmem>>, %arg3: memref<32x96xf32, #tpu.memory_space<vmem>>, %arg4: memref<1x96xf32, #tpu.memory_space<vmem>>, %arg5: memref<32x128xf32, #tpu.memory_space<vmem>>, %arg6: memref<1x128xf32, #tpu.memory_space<vmem>>, %arg7: memref<1x8x128xf32, #tpu.memory_space<vmem>>) attributes {dimension_semantics = [#tpu.dimension_semantics<parallel>], iteration_bounds = array<i64: 2>, scalar_prefetch = 0 : i64, scratch_operands = 0 : i64, tpu.core_type = #tpu.core_type<tc>, window_params = [{transform_indices = @transform_0, window_bounds = array<i64: 1, 8, 32>}, {transform_indices = @transform_1, window_bounds = array<i64: 1, 8, 8>}, {pipeline_mode = #tpu.pipeline_mode<synchronous>, transform_indices = @transform_2, window_bounds = array<i64: 32, 96>}, {pipeline_mode = #tpu.pipeline_mode<synchronous>, transform_indices = @transform_3, window_bounds = array<i64: 1, 96>}, {pipeline_mode = #tpu.pipeline_mode<synchronous>, transform_indices = @transform_4, window_bounds = array<i64: 32, 128>}, {pipeline_mode = #tpu.pipeline_mode<synchronous>, transform_indices = @transform_5, window_bounds = array<i64: 1, 128>}, {transform_indices = @transform_6, window_bounds = array<i64: 1, 8, 128>}]} {
    %c0 = arith.constant 0 : index
    %c0_0 = arith.constant 0 : index
    %0 = vector.load %arg3[%c0, %c0_0] : memref<32x96xf32, #tpu.memory_space<vmem>>, vector<32x96xf32>
    %c0_1 = arith.constant 0 : index
    %c0_2 = arith.constant 0 : index
    %1 = vector.load %arg4[%c0_1, %c0_2] : memref<1x96xf32, #tpu.memory_space<vmem>>, vector<1x96xf32>
    %c0_3 = arith.constant 0 : index
    %c0_4 = arith.constant 0 : index
    %2 = vector.load %arg5[%c0_3, %c0_4] : memref<32x128xf32, #tpu.memory_space<vmem>>, vector<32x128xf32>
    %c0_5 = arith.constant 0 : index
    %c0_6 = arith.constant 0 : index
    %3 = vector.load %arg6[%c0_5, %c0_6] : memref<1x128xf32, #tpu.memory_space<vmem>>, vector<1x128xf32>
    %c0_7 = arith.constant 0 : index
    %c0_8 = arith.constant 0 : index
    %c0_9 = arith.constant 0 : index
    %4 = vector.load %arg1[%c0_7, %c0_8, %c0_9] : memref<1x8x32xf32, #tpu.memory_space<vmem>>, vector<1x8x32xf32>
    %5 = vector.shape_cast %4 : vector<1x8x32xf32> to vector<8x32xf32>
    %cst = arith.constant dense<0.000000e+00> : vector<8x96xf32>
    %6 = tpu.matmul %5, %0, %cst {dimension_numbers = #tpu.dot_dimension_numbers<[1], [0], [0], [1], [0, 0, 1, 1], [], []>} : vector<8x32xf32>, vector<32x96xf32>, vector<8x96xf32> -> vector<8x96xf32>
    %7 = vector.broadcast %1 : vector<1x96xf32> to vector<8x96xf32>
    %8 = arith.addf %6, %7 : vector<8x96xf32>
    %9 = vector.extract_strided_slice %8 {offsets = [0, 0], sizes = [8, 32], strides = [1, 1]} : vector<8x96xf32> to vector<8x32xf32>
    %10 = vector.shape_cast %9 : vector<8x32xf32> to vector<1x8x32xf32>
    %11 = vector.extract_strided_slice %8 {offsets = [0, 32], sizes = [8, 32], strides = [1, 1]} : vector<8x96xf32> to vector<8x32xf32>
    %12 = vector.shape_cast %11 : vector<8x32xf32> to vector<1x8x32xf32>
    %13 = vector.extract_strided_slice %8 {offsets = [0, 64], sizes = [8, 32], strides = [1, 1]} : vector<8x96xf32> to vector<8x32xf32>
    %14 = vector.shape_cast %13 : vector<8x32xf32> to vector<1x8x32xf32>
    %c0_10 = arith.constant 0 : index
    %c0_11 = arith.constant 0 : index
    %c0_12 = arith.constant 0 : index
    %15 = vector.load %arg2[%c0_10, %c0_11, %c0_12] : memref<1x8x8xi8, #tpu.memory_space<vmem>>, vector<1x8x8xi8>
    %16 = arith.sitofp %15 : vector<1x8x8xi8> to vector<1x8x8xf32>
    %cst_13 = arith.constant 1.000000e+00 : f32
    %17 = vector.broadcast %cst_13 : f32 to vector<1x8x8xf32>
    %18 = arith.subf %17, %16 : vector<1x8x8xf32>
    %cst_14 = arith.constant -1.000000e+10 : f32
    %19 = vector.broadcast %cst_14 : f32 to vector<1x8x8xf32>
    %20 = arith.mulf %18, %19 : vector<1x8x8xf32>
    %21 = vector.extract_strided_slice %10 {offsets = [0, 0, 0], sizes = [1, 8, 8], strides = [1, 1, 1]} : vector<1x8x32xf32> to vector<1x8x8xf32>
    %22 = vector.extract_strided_slice %12 {offsets = [0, 0, 0], sizes = [1, 8, 8], strides = [1, 1, 1]} : vector<1x8x32xf32> to vector<1x8x8xf32>
    %23 = vector.extract_strided_slice %14 {offsets = [0, 0, 0], sizes = [1, 8, 8], strides = [1, 1, 1]} : vector<1x8x32xf32> to vector<1x8x8xf32>
    "tpu.trace_start"() <{level = 10 : i32, message = "bqd,bkd->bqk"}> : () -> ()
    %cst_15 = arith.constant dense<0.000000e+00> : vector<1x8x8xf32>
    %24 = tpu.matmul %21, %22, %cst_15 {dimension_numbers = #tpu.dot_dimension_numbers<[2], [2], [1], [1], [0, 0, 0, 1, 1, 1], [0], [0]>} : vector<1x8x8xf32>, vector<1x8x8xf32>, vector<1x8x8xf32> -> vector<1x8x8xf32>
    "tpu.trace_stop"() : () -> ()
    %25 = arith.addf %24, %20 : vector<1x8x8xf32>
    %cst_16 = arith.constant dense<0xFF800000> : vector<1x8xf32>
    %26 = vector.multi_reduction <maximumf>, %25, %cst_16 [2] : vector<1x8x8xf32> to vector<1x8xf32>
    %27 = vector.shape_cast %26 : vector<1x8xf32> to vector<1x8x1xf32>
    %28 = vector.broadcast %27 : vector<1x8x1xf32> to vector<1x8x8xf32>
    %29 = arith.subf %25, %28 : vector<1x8x8xf32>
    %30 = math.exp %29 : vector<1x8x8xf32>
    %cst_17 = arith.constant dense<0.000000e+00> : vector<1x8xf32>
    %31 = vector.multi_reduction <add>, %30, %cst_17 [2] : vector<1x8x8xf32> to vector<1x8xf32>
    %32 = vector.shape_cast %31 : vector<1x8xf32> to vector<1x8x1xf32>
    "tpu.trace_start"() <{level = 10 : i32, message = "bqk,bkd->bqd"}> : () -> ()
    %cst_18 = arith.constant dense<0.000000e+00> : vector<1x8x8xf32>
    %33 = tpu.matmul %30, %23, %cst_18 {dimension_numbers = #tpu.dot_dimension_numbers<[2], [1], [1], [2], [0, 0, 0, 1, 1, 2], [0], [0]>} : vector<1x8x8xf32>, vector<1x8x8xf32>, vector<1x8x8xf32> -> vector<1x8x8xf32>
    "tpu.trace_stop"() : () -> ()
    %34 = tpu.reciprocal %32 : vector<1x8x1xf32> -> vector<1x8x1xf32>
    %35 = vector.broadcast %34 : vector<1x8x1xf32> to vector<1x8x8xf32>
    %36 = arith.mulf %33, %35 : vector<1x8x8xf32>
    %37 = vector.extract_strided_slice %10 {offsets = [0, 0, 8], sizes = [1, 8, 8], strides = [1, 1, 1]} : vector<1x8x32xf32> to vector<1x8x8xf32>
    %38 = vector.extract_strided_slice %12 {offsets = [0, 0, 8], sizes = [1, 8, 8], strides = [1, 1, 1]} : vector<1x8x32xf32> to vector<1x8x8xf32>
    %39 = vector.extract_strided_slice %14 {offsets = [0, 0, 8], sizes = [1, 8, 8], strides = [1, 1, 1]} : vector<1x8x32xf32> to vector<1x8x8xf32>
    "tpu.trace_start"() <{level = 10 : i32, message = "bqd,bkd->bqk"}> : () -> ()
    %cst_19 = arith.constant dense<0.000000e+00> : vector<1x8x8xf32>
    %40 = tpu.matmul %37, %38, %cst_19 {dimension_numbers = #tpu.dot_dimension_numbers<[2], [2], [1], [1], [0, 0, 0, 1, 1, 1], [0], [0]>} : vector<1x8x8xf32>, vector<1x8x8xf32>, vector<1x8x8xf32> -> vector<1x8x8xf32>
    "tpu.trace_stop"() : () -> ()
    %41 = arith.addf %40, %20 : vector<1x8x8xf32>
    %cst_20 = arith.constant dense<0xFF800000> : vector<1x8xf32>
    %42 = vector.multi_reduction <maximumf>, %41, %cst_20 [2] : vector<1x8x8xf32> to vector<1x8xf32>
    %43 = vector.shape_cast %42 : vector<1x8xf32> to vector<1x8x1xf32>
    %44 = vector.broadcast %43 : vector<1x8x1xf32> to vector<1x8x8xf32>
    %45 = arith.subf %41, %44 : vector<1x8x8xf32>
    %46 = math.exp %45 : vector<1x8x8xf32>
    %cst_21 = arith.constant dense<0.000000e+00> : vector<1x8xf32>
    %47 = vector.multi_reduction <add>, %46, %cst_21 [2] : vector<1x8x8xf32> to vector<1x8xf32>
    %48 = vector.shape_cast %47 : vector<1x8xf32> to vector<1x8x1xf32>
    "tpu.trace_start"() <{level = 10 : i32, message = "bqk,bkd->bqd"}> : () -> ()
    %cst_22 = arith.constant dense<0.000000e+00> : vector<1x8x8xf32>
    %49 = tpu.matmul %46, %39, %cst_22 {dimension_numbers = #tpu.dot_dimension_numbers<[2], [1], [1], [2], [0, 0, 0, 1, 1, 2], [0], [0]>} : vector<1x8x8xf32>, vector<1x8x8xf32>, vector<1x8x8xf32> -> vector<1x8x8xf32>
    "tpu.trace_stop"() : () -> ()
    %50 = tpu.reciprocal %48 : vector<1x8x1xf32> -> vector<1x8x1xf32>
    %51 = vector.broadcast %50 : vector<1x8x1xf32> to vector<1x8x8xf32>
    %52 = arith.mulf %49, %51 : vector<1x8x8xf32>
    %53 = vector.extract_strided_slice %10 {offsets = [0, 0, 16], sizes = [1, 8, 8], strides = [1, 1, 1]} : vector<1x8x32xf32> to vector<1x8x8xf32>
    %54 = vector.extract_strided_slice %12 {offsets = [0, 0, 16], sizes = [1, 8, 8], strides = [1, 1, 1]} : vector<1x8x32xf32> to vector<1x8x8xf32>
    %55 = vector.extract_strided_slice %14 {offsets = [0, 0, 16], sizes = [1, 8, 8], strides = [1, 1, 1]} : vector<1x8x32xf32> to vector<1x8x8xf32>
    "tpu.trace_start"() <{level = 10 : i32, message = "bqd,bkd->bqk"}> : () -> ()
    %cst_23 = arith.constant dense<0.000000e+00> : vector<1x8x8xf32>
    %56 = tpu.matmul %53, %54, %cst_23 {dimension_numbers = #tpu.dot_dimension_numbers<[2], [2], [1], [1], [0, 0, 0, 1, 1, 1], [0], [0]>} : vector<1x8x8xf32>, vector<1x8x8xf32>, vector<1x8x8xf32> -> vector<1x8x8xf32>
    "tpu.trace_stop"() : () -> ()
    %57 = arith.addf %56, %20 : vector<1x8x8xf32>
    %cst_24 = arith.constant dense<0xFF800000> : vector<1x8xf32>
    %58 = vector.multi_reduction <maximumf>, %57, %cst_24 [2] : vector<1x8x8xf32> to vector<1x8xf32>
    %59 = vector.shape_cast %58 : vector<1x8xf32> to vector<1x8x1xf32>
    %60 = vector.broadcast %59 : vector<1x8x1xf32> to vector<1x8x8xf32>
    %61 = arith.subf %57, %60 : vector<1x8x8xf32>
    %62 = math.exp %61 : vector<1x8x8xf32>
    %cst_25 = arith.constant dense<0.000000e+00> : vector<1x8xf32>
    %63 = vector.multi_reduction <add>, %62, %cst_25 [2] : vector<1x8x8xf32> to vector<1x8xf32>
    %64 = vector.shape_cast %63 : vector<1x8xf32> to vector<1x8x1xf32>
    "tpu.trace_start"() <{level = 10 : i32, message = "bqk,bkd->bqd"}> : () -> ()
    %cst_26 = arith.constant dense<0.000000e+00> : vector<1x8x8xf32>
    %65 = tpu.matmul %62, %55, %cst_26 {dimension_numbers = #tpu.dot_dimension_numbers<[2], [1], [1], [2], [0, 0, 0, 1, 1, 2], [0], [0]>} : vector<1x8x8xf32>, vector<1x8x8xf32>, vector<1x8x8xf32> -> vector<1x8x8xf32>
    "tpu.trace_stop"() : () -> ()
    %66 = tpu.reciprocal %64 : vector<1x8x1xf32> -> vector<1x8x1xf32>
    %67 = vector.broadcast %66 : vector<1x8x1xf32> to vector<1x8x8xf32>
    %68 = arith.mulf %65, %67 : vector<1x8x8xf32>
    %69 = vector.extract_strided_slice %10 {offsets = [0, 0, 24], sizes = [1, 8, 8], strides = [1, 1, 1]} : vector<1x8x32xf32> to vector<1x8x8xf32>
    %70 = vector.extract_strided_slice %12 {offsets = [0, 0, 24], sizes = [1, 8, 8], strides = [1, 1, 1]} : vector<1x8x32xf32> to vector<1x8x8xf32>
    %71 = vector.extract_strided_slice %14 {offsets = [0, 0, 24], sizes = [1, 8, 8], strides = [1, 1, 1]} : vector<1x8x32xf32> to vector<1x8x8xf32>
    "tpu.trace_start"() <{level = 10 : i32, message = "bqd,bkd->bqk"}> : () -> ()
    %cst_27 = arith.constant dense<0.000000e+00> : vector<1x8x8xf32>
    %72 = tpu.matmul %69, %70, %cst_27 {dimension_numbers = #tpu.dot_dimension_numbers<[2], [2], [1], [1], [0, 0, 0, 1, 1, 1], [0], [0]>} : vector<1x8x8xf32>, vector<1x8x8xf32>, vector<1x8x8xf32> -> vector<1x8x8xf32>
    "tpu.trace_stop"() : () -> ()
    %73 = arith.addf %72, %20 : vector<1x8x8xf32>
    %cst_28 = arith.constant dense<0xFF800000> : vector<1x8xf32>
    %74 = vector.multi_reduction <maximumf>, %73, %cst_28 [2] : vector<1x8x8xf32> to vector<1x8xf32>
    %75 = vector.shape_cast %74 : vector<1x8xf32> to vector<1x8x1xf32>
    %76 = vector.broadcast %75 : vector<1x8x1xf32> to vector<1x8x8xf32>
    %77 = arith.subf %73, %76 : vector<1x8x8xf32>
    %78 = math.exp %77 : vector<1x8x8xf32>
    %cst_29 = arith.constant dense<0.000000e+00> : vector<1x8xf32>
    %79 = vector.multi_reduction <add>, %78, %cst_29 [2] : vector<1x8x8xf32> to vector<1x8xf32>
    %80 = vector.shape_cast %79 : vector<1x8xf32> to vector<1x8x1xf32>
    "tpu.trace_start"() <{level = 10 : i32, message = "bqk,bkd->bqd"}> : () -> ()
    %cst_30 = arith.constant dense<0.000000e+00> : vector<1x8x8xf32>
    %81 = tpu.matmul %78, %71, %cst_30 {dimension_numbers = #tpu.dot_dimension_numbers<[2], [1], [1], [2], [0, 0, 0, 1, 1, 2], [0], [0]>} : vector<1x8x8xf32>, vector<1x8x8xf32>, vector<1x8x8xf32> -> vector<1x8x8xf32>
    "tpu.trace_stop"() : () -> ()
    %82 = tpu.reciprocal %80 : vector<1x8x1xf32> -> vector<1x8x1xf32>
    %83 = vector.broadcast %82 : vector<1x8x1xf32> to vector<1x8x8xf32>
    %84 = arith.mulf %81, %83 : vector<1x8x8xf32>
    %85 = tpu.concatenate %36, %52, %68, %84 in 2 : vector<1x8x8xf32>, vector<1x8x8xf32>, vector<1x8x8xf32>, vector<1x8x8xf32> -> vector<1x8x32xf32>
    %86 = vector.shape_cast %85 : vector<1x8x32xf32> to vector<8x32xf32>
    %cst_31 = arith.constant dense<0.000000e+00> : vector<8x128xf32>
    %87 = tpu.matmul %86, %2, %cst_31 {dimension_numbers = #tpu.dot_dimension_numbers<[1], [0], [0], [1], [0, 0, 1, 1], [], []>} : vector<8x32xf32>, vector<32x128xf32>, vector<8x128xf32> -> vector<8x128xf32>
    %88 = vector.broadcast %3 : vector<1x128xf32> to vector<8x128xf32>
    %89 = arith.addf %87, %88 : vector<8x128xf32>
    %90 = vector.shape_cast %89 : vector<8x128xf32> to vector<1x8x128xf32>
    %c0_32 = arith.constant 0 : index
    %c0_33 = arith.constant 0 : index
    %c0_34 = arith.constant 0 : index
    %91 = vector.load %arg7[%c0_32, %c0_33, %c0_34] : memref<1x8x128xf32, #tpu.memory_space<vmem>>, vector<1x8x128xf32>
    tpu.vector_store %arg7[%c0_32, %c0_33, %c0_34], %90 {strides = array<i32>} : memref<1x8x128xf32, #tpu.memory_space<vmem>>, vector<1x8x128xf32>,
    return
  }
  func.func @transform_0(%arg0: i32) -> (i32, i32, i32) {
    %c0_i32 = arith.constant 0 : i32
    %c0_i32_0 = arith.constant 0 : i32
    %c0_i32_1 = arith.constant 0 : i32
    return %arg0, %c0_i32, %c0_i32_0 : i32, i32, i32
  }
  func.func @transform_1(%arg0: i32) -> (i32, i32, i32) {
    %c0_i32 = arith.constant 0 : i32
    %c0_i32_0 = arith.constant 0 : i32
    %c0_i32_1 = arith.constant 0 : i32
    return %arg0, %c0_i32, %c0_i32_0 : i32, i32, i32
  }
  func.func @transform_2(%arg0: i32) -> (i32, i32) {
    %c0_i32 = arith.constant 0 : i32
    %c0_i32_0 = arith.constant 0 : i32
    %c0_i32_1 = arith.constant 0 : i32
    return %c0_i32, %c0_i32_0 : i32, i32
  }
  func.func @transform_3(%arg0: i32) -> (i32, i32) {
    %c0_i32 = arith.constant 0 : i32
    %c0_i32_0 = arith.constant 0 : i32
    %c0_i32_1 = arith.constant 0 : i32
    return %c0_i32, %c0_i32_0 : i32, i32
  }
  func.func @transform_4(%arg0: i32) -> (i32, i32) {
    %c0_i32 = arith.constant 0 : i32
    %c0_i32_0 = arith.constant 0 : i32
    %c0_i32_1 = arith.constant 0 : i32
    return %c0_i32, %c0_i32_0 : i32, i32
  }
  func.func @transform_5(%arg0: i32) -> (i32, i32) {
    %c0_i32 = arith.constant 0 : i32
    %c0_i32_0 = arith.constant 0 : i32
    %c0_i32_1 = arith.constant 0 : i32
    return %c0_i32, %c0_i32_0 : i32, i32
  }
  func.func @transform_6(%arg0: i32) -> (i32, i32, i32) {
    %c0_i32 = arith.constant 0 : i32
    %c0_i32_0 = arith.constant 0 : i32
    %c0_i32_1 = arith.constant 0 : i32
    return %arg0, %c0_i32, %c0_i32_0 : i32, i32, i32
  }
}

</mosaic_0001>

<bundles_post_ra>
// kernel: tpu_custom_call.1
= control target key start
LH: loop header
LB: loop body
LE: loop exit
PB: predicated region body
PF: predicated region fallthrough
CT: control target
= control target key end

     0   :  { %s2168_s0 = inlined_call_operand.hbm [shape: f32[2,8,32], index: 0, kind: input, shape index: {}]   ;;  %s2169_s1 = inlined_call_operand.hbm [shape: s8[2,8,8], index: 1, kind: input, shape index: {}]   ;;  %s2170_s2 = inlined_call_operand.hbm [shape: f32[32,96], index: 2, kind: input, shape index: {}]   ;;  %s2171_s3 = inlined_call_operand.vmem [shape: f32[1,96], index: 3, kind: input, shape index: {}]   ;;  %s2172_s4 = inlined_call_operand.hbm [shape: f32[32,128], index: 4, kind: input, shape index: {}]   ;;  %s2173_s5 = inlined_call_operand.vmem [shape: f32[1,128], index: 5, kind: input, shape index: {}]   ;;  %s2174_s6 = inlined_call_operand.hbm [shape: f32[2,8,128], index: 6, kind: output, shape index: {}]  }
   0x1   :  { %2179 = sst [smem:[#allocation16_spill]] %s2168_s0 }
   0x2   :  { %2180 = sst [smem:[#allocation17_spill]] %s2170_s2 }
   0x3   :  { %11 = vsyncpa [#allocation3], 0 }
   0x4   :  { %13 = vsyncpa [#allocation3 + $0x1], 0 }
   0x5   :  { %14 = vsyncpa [#allocation6], 0 }
   0x6   :  { %16 = vsyncpa [#allocation6 + $0x1], 0 }
   0x7   :  { %17 = vsyncpa [#allocation9], 0 }
   0x8   :  { %18 = vsyncpa [#allocation4], 0 }
   0x9   :  { %20 = vsyncpa [#allocation4 + $0x1], 0  ;;  %s1809_s21 = smov 0   ;;  %s1811_s22 = smov 0  }
   0xa   :  { %s1813_s23 = smov 0   ;;  %s1815_s24 = smov 0  }
   0xb LB: > { %s1830_s25 = sadd.s32 4294967295, %s1748_s24   ;;  %s1312_s26 = sadd.s32 4294967294, %s1748_s24   ;;  %s1748_s24 = sphi %s1815_s24, %s2203_s24   ;;  %s1744_s23 = sphi %s1813_s23, %s2202_s23   ;;  %s1740_s22 = sphi %s1811_s22, %s2201_s22   ;;  %s1736_s21 = sphi %s1809_s21, %s2200_s21  }
   0xc   : > { %p46_p0 = scmp.ne.s32.totalorder %s1740_s22, %s1736_s21  ;;  %p2175_p1 = scmp.eq.s32.totalorder %s1830_s25, 0 }
   0xd   : > { %p186_p3 = scmp.eq.s32.totalorder %s1312_s26, 1  ;;  %p1313_p5 = scmp.ge.s32.totalorder %s1748_s24, 1 }
   0xe   : > { %p1839_p4 = por %p2175_p1, %p46_p0  ;;  %p193_p7 = scmp.lt.s32.totalorder %s1748_s24, 3 }
   0xf   : > { %p1844_p6 = por %p186_p3, %p46_p0  ;;  %s1750_s30 = smov [#allocation7]  }
  0x10   : > { %s2181_s27 = scalar_select %p1839_p4, 1, 0 }
  0x11   : > { %s2182_s28 = scalar_select %p1844_p6, 1, 0 }
  0x12   : > { %p1849_p8 = pnand %p1313_p5, %p193_p7  ;;  %s205_s7 = sshll.u32 %s1750_s30, 4  ;;  %s1853_s7 = int_to_ptr.vmem [resolvable:$true] %s205_s7 }
  0x13   : > { %s1751_s9 = smov [#allocation8]   ;;  %s2185_s2 = sld [smem:[#allocation17_spill]] }
  0x14   : > { %s2183_s29 = scalar_select %p1849_p8, 1, 0 }
  0x15   : > { %p1461_p9 = pneg %p1849_p8  ;;  %s221_s10 = sshll.u32 %s1751_s9, 4  ;;  %s1864_s10 = int_to_ptr.vmem [resolvable:$true] %s221_s10 }
  0x17   : > { %p1860_p11 = pnand %p1461_p9, %p2175_p1 }
  0x19   : > { %s1554_s13 = scalar_lea.hbm %s2185_s2, 512  ;;  %p1556_p13 = pneg %p1860_p11 }
  0x1a   : > { %p1555_p12 = scmp.ne.s32.totalorder %s2185_s2, %s1554_s13  ;;  %p1561_p5 = scmp.lt.u32.totalorder %s1554_s13, %s2185_s2 }
  0x1c   : > { %p1557_p0 = pnand %p1556_p13, %p1555_p12 }
  0x1e   : > { %p1558_p3 = pneg %p1557_p0 }
  0x20   : > { %p1563_p7 = pnand %p1561_p5, %p1558_p3 }
  0x22   : > { %1566 = shalt.err (!%p1563_p7)
}
  0x23   : > { %s1567_s18 = scalar_lea.vmem %s1853_s7, 512  ;;  %p1575_p2 = scmp.lt.s32.totalorder %s1853_s7, %s1853_s7 }
  0x24   : > { %p1568_p9 = scmp.ne.s32.totalorder %s1853_s7, %s1567_s18  ;;  %p1576_p12 = scmp.lt.s32.totalorder %s1567_s18, %s1567_s18 }
  0x26   : > { %p1570_p10 = pnand %p1568_p9, %p1556_p13  ;;  %p1577_p0 = por %p1576_p12, %p1575_p2 }
  0x28   : > { %p1571_p1 = pneg %p1570_p10 }
  0x2a   : > { %p1578_p6 = pnand %p1577_p0, %p1571_p1 }
  0x2c   : > { %1581 = shalt.err (!%p1578_p6)
}
  0x2d   : > { %s1752_s19 = smov 128   ;;  %s1753_s20 = smov 8  }
  0x2e   : > { %1464 = dma.hbm_to_vmem [thread:$0]  (!%p1860_p11), %s2185_s2, 512, %s1853_s7, [#allocation6], %s1752_s19, %s1752_s19, %s1753_s20  }
  0x2f   : > { %s1582_s12 = scalar_lea.hbm %s2172_s4, 512 }
  0x30   : > { %p1583_p2 = scmp.ne.s32.totalorder %s2172_s4, %s1582_s12  ;;  %p1589_p10 = scmp.lt.u32.totalorder %s1582_s12, %s2172_s4 }
  0x32   : > { %p1585_p1 = pnand %p1583_p2, %p1556_p13 }
  0x34   : > { %p1586_p6 = pneg %p1585_p1 }
  0x36   : > { %p1591_p3 = pnand %p1589_p10, %p1586_p6 }
  0x38   : > { %1594 = shalt.err (!%p1591_p3)
}
  0x39   : > { %s1595_s7 = scalar_lea.vmem %s1864_s10, 512  ;;  %p1603_p12 = scmp.lt.s32.totalorder %s1864_s10, %s1864_s10 }
  0x3a   : > { %p1596_p5 = scmp.ne.s32.totalorder %s1864_s10, %s1595_s7  ;;  %p1604_p0 = scmp.lt.s32.totalorder %s1595_s7, %s1595_s7 }
  0x3c   : > { %p1598_p7 = pnand %p1596_p5, %p1556_p13  ;;  %p1605_p2 = por %p1604_p0, %p1603_p12 }
  0x3e   : > { %p1599_p9 = pneg %p1598_p7 }
  0x40   : > { %p1606_p1 = pnand %p1605_p2, %p1599_p9 }
  0x42   : > { %1609 = shalt.err (!%p1606_p1)
}
  0x43   : > { %1467 = dma.hbm_to_vmem [thread:$0]  (!%p1860_p11), %s2172_s4, 512, %s1864_s10, [#allocation9], %s1752_s19, %s1752_s19, %s1753_s20  }
  0x44   : > { %s1919_s26 = sadd.s32 1, %s1748_s24   ;;  %s33_s8 = sadd.s32 1, %s1744_s23 }
  0x45   : > { %s30_s30 = ssub.s32 %s1748_s24, %s1919_s26  ;;  %p40_p13 = scmp.ne.s32.totalorder %s1744_s23, %s1740_s22 }
  0x46   : > { %p31_p6 = scmp.eq.s32.totalorder %s30_s30, 0  ;;  %p41_p10 = scmp.eq.s32.totalorder %s1748_s24, 0 }
  0x47   : > { %p2186_p3 = scmp.eq.s32.totalorder %s1830_s25, 1  ;;  %p1481_p7 = scmp.lt.s32.totalorder %s1748_s24, 2 }
  0x48   : > { %s1935_s11 = scalar_select %p31_p6, %s1744_s23, %s33_s8  }
  0x49   : > { %p1929_p5 = por %p2186_p3, %p40_p13  ;;  %p42_p9 = por %p41_p10, %p40_p13 }
  0x4a   : > { %s1938_s12 = sand.u32 1, %s1744_s23   ;;  %s1318_s19 = sshll.u32 %s1748_s24, 7 }
  0x4b   : > { %s2187_s9 = scalar_select %p1929_p5, 1, 0 }
  0x4c   : > { %s1317_s10 = sshll.u32 %s1938_s12, 3  ;;  %s2188_s0 = sld [smem:[#allocation16_spill]] }
  0x4d   : > { %s242_s15 = scalar_lea.vmem [#allocation2], %s1317_s10  ;;  %p1949_p11 = pnand %p1481_p7, %p42_p9 }
  0x4e   : > { %s249_s16 = sshll.u32 %s242_s15, 4  ;;  %s1319_s18 = sshll.u32 %s1938_s12, 1  ;;  %s1947_s16 = int_to_ptr.vmem [resolvable:$true] %s249_s16 }
  0x4f   : > { %s239_s8 = scalar_lea.sflag [#allocation3], %s1938_s12  ;;  %p1612_p0 = pneg %p1949_p11 }
  0x52   : > { %s1945_s14 = scalar_lea.hbm %s2188_s0, %s1318_s19  ;;  %s1615_s20 = scalar_lea.hbm %s2188_s0, 256 }
  0x53   : > { %s1610_s30 = scalar_lea.hbm %s1945_s14, 128  ;;  %p1616_p13 = scmp.lt.u32.totalorder %s1945_s14, %s2188_s0 }
  0x54   : > { %p1611_p12 = scmp.ne.s32.totalorder %s1945_s14, %s1610_s30  ;;  %p1617_p6 = scmp.lt.u32.totalorder %s1615_s20, %s1610_s30 }
  0x55   : > { %p1619_p3 = scmp.lt.u32.totalorder %s1610_s30, %s1945_s14 }
  0x56   : > { %p1613_p2 = pnand %p1612_p0, %p1611_p12  ;;  %p1618_p10 = por %p1617_p6, %p1616_p13 }
  0x58   : > { %p1614_p1 = pneg %p1613_p2  ;;  %p1620_p7 = por %p1619_p3, %p1618_p10 }
  0x5a   : > { %p1621_p9 = pnand %p1620_p7, %p1614_p1 }
  0x5c   : > { %1624 = shalt.err (!%p1621_p9)
}
  0x5d   : > { %s1625_s17 = scalar_lea.vmem %s1947_s16, 128  ;;  %s1754_s10 = smov [#allocation2]  }
  0x5e   : > { %p1626_p12 = scmp.ne.s32.totalorder %s1947_s16, %s1625_s17  ;;  %s1630_s19 = sshll.u32 %s1754_s10, 4  ;;  %s1631_s19 = int_to_ptr.vmem [resolvable:$false] %s1630_s19 }
  0x5f   : > { %s1632_s13 = scalar_lea.vmem %s1631_s19, 256  ;;  %p1633_p4 = scmp.lt.s32.totalorder %s1947_s16, %s1631_s19 }
  0x60   : > { %p1628_p2 = pnand %p1626_p12, %p1612_p0  ;;  %p1634_p13 = scmp.lt.s32.totalorder %s1632_s13, %s1625_s17 }
  0x62   : > { %p1629_p5 = pneg %p1628_p2  ;;  %p1635_p6 = por %p1634_p13, %p1633_p4 }
  0x64   : > { %p1636_p10 = pnand %p1635_p6, %p1629_p5 }
  0x66   : > { %1639 = shalt.err (!%p1636_p10)
}
  0x67   : > { %1471 = dma.hbm_to_vmem [thread:$0]  (!%p1949_p11), %s1945_s14, 128, %s1947_s16, %s239_s8  }
  0x68   : > { %s1320_s30 = sshll.u32 %s1748_s24, 5  ;;  %s260_s17 = scalar_lea.vmem [#allocation5], %s1319_s18 }
  0x69   : > { %s1985_s10 = scalar_lea.hbm %s2169_s1, %s1320_s30  ;;  %s267_s19 = sshll.u32 %s260_s17, 4  ;;  %s268_s19 = int_to_ptr.vmem [resolvable:$true] %s267_s19 }
  0x6a   : > { %s2190_s13 = sand.u32 1, %s1748_s24   ;;  %s1640_s2 = scalar_lea.hbm %s1985_s10, 32 }
  0x6b   : > { %s257_s0 = scalar_lea.sflag [#allocation6], %s2190_s13  ;;  %p1641_p4 = scmp.ne.s32.totalorder %s1985_s10, %s1640_s2 }
  0x6c   : > { %s1645_s8 = scalar_lea.hbm %s2169_s1, 64  ;;  %p1646_p3 = scmp.lt.u32.totalorder %s1985_s10, %s2169_s1 }
  0x6d   : > { %p1643_p5 = pnand %p1641_p4, %p1612_p0  ;;  %p1647_p7 = scmp.lt.u32.totalorder %s1645_s8, %s1640_s2 }
  0x6e   : > { %p1649_p12 = scmp.lt.u32.totalorder %s1640_s2, %s1985_s10 }
  0x6f   : > { %p1644_p1 = pneg %p1643_p5  ;;  %p1648_p9 = por %p1647_p7, %p1646_p3 }
  0x71   : > { %p1650_p2 = por %p1649_p12, %p1648_p9 }
  0x73   : > { %p1651_p13 = pnand %p1650_p2, %p1644_p1 }
  0x75   : > { %1654 = shalt.err (!%p1651_p13)
}
  0x76   : > { %s1655_s18 = scalar_lea.vmem %s268_s19, 32  ;;  %s1755_s20 = smov [#allocation5]  }
  0x77   : > { %p1656_p6 = scmp.ne.s32.totalorder %s268_s19, %s1655_s18  ;;  %s1660_s15 = sshll.u32 %s1755_s20, 4  ;;  %s1661_s15 = int_to_ptr.vmem [resolvable:$false] %s1660_s15 }
  0x78   : > { %s1662_s17 = scalar_lea.vmem %s1661_s15, 64  ;;  %p1663_p5 = scmp.lt.s32.totalorder %s268_s19, %s1661_s15 }
  0x79   : > { %p1658_p10 = pnand %p1656_p6, %p1612_p0  ;;  %p1664_p8 = scmp.lt.s32.totalorder %s1662_s17, %s1655_s18 }
  0x7b   : > { %p1659_p4 = pneg %p1658_p10  ;;  %p1665_p3 = por %p1664_p8, %p1663_p5 }
  0x7d   : > { %p1666_p7 = pnand %p1665_p3, %p1659_p4 }
  0x7f   : > { %1669 = shalt.err (!%p1666_p7)
}
  0x80   : > { %1474 = dma.hbm_to_vmem [thread:$0]  (!%p1949_p11), %s1985_s10, 32, %s268_s19, %s257_s0  }
  0x81   : > { %p2191_p1 = scmp.ne.s32.totalorder %s2183_s29, 0 }
  0x82   : > { %s2013_s2 = sand.u32 (!%p2191_p1), 1, %s1740_s22   ;;  %p2192_p8 = scmp.ne.s32.totalorder (!%p2191_p1), %s2181_s27, 0 }
  0x83   : > { %276 = sbr.rel (%p2191_p1) target bundleno = 1806 (0x70e), region = 44  ;;  %s1322_s13 = sshll.u32 (!%p2191_p1), %s2013_s2, 3 }
  0x84   : > { %s279_s14 = scalar_lea.sflag (!%p2191_p1), [#allocation3], %s2013_s2  ;;  %s282_s16 = scalar_lea.vmem (!%p2191_p1), [#allocation2], %s1322_s13 }
  0x8a   : > { %1715 = dma.done.wait (%p2192_p8), %s279_s14, 128  }
  0x8b   : > { %1717 = vsyncadd (%p2192_p8), %s279_s14, 4294967168  ;;  %s287_s0 = sand.u32 1, %s1830_s25   ;;  %s1323_s29 = sshll.u32 %s2013_s2, 1 }
  0x8c   : > { %s288_s7 = scalar_lea.sflag [#allocation6], %s287_s0  ;;  %s2025_s10 = scalar_lea.vmem [#allocation5], %s1323_s29 }
  0x8d   : > { %1719 = dma.done.wait (%p2192_p8), %s288_s7, 32  }
  0x8e   : > { %1721 = vsyncadd (%p2192_p8), %s288_s7, 4294967264  ;;  %p2193_p11 = scmp.eq.s32.totalorder %s1830_s25, 0 }
  0x90   : > { %1723 = dma.done.wait (%p2193_p11), [#allocation6], 512   ;;  %p2194_p0 = pmov %p2193_p11 }
  0x92   : > { %1725 = vsyncadd (%p2194_p0), [#allocation6], 4294966784  ;;  %p2195_p9 = pmov %p2194_p0 }
  0x93   : > { %p2196_p12 = pmov %p2194_p0 }
  0x94   : > { %1727 = dma.done.wait (%p2195_p9), [#allocation9], 512  }
  0x95   : > { %1729 = vsyncadd (%p2196_p12), [#allocation9], 4294966784  ;;  %v1756_v0 = vmov 0.0|0.0   ;;  %vm1757_vm0 = vmmov 0   ;;  %v1758_v1 = vmov 0.0   ;;  %v333_v2 = vld [vmem:[#allocation7] sm:$0xff] }
  0x96   : > { %1435 = vmatprep.subr.bf16.mxu0 %v1756_v0  ;;  %1381 = vmatprep.mubr.msk.f32.mxu0 %vm1757_vm0, %v1758_v1  ;;  %v334_v3 = vld [vmem:[#allocation7 + $0x8] sm:$0xff]  ;;  %v335_v4 = vld [vmem:[#allocation7 + $0x10] sm:$0xff]  ;;  %v336_v6 = vld [vmem:[#allocation7 + $0x18] sm:$0xff]  ;;  %vm350_vm1 = vcmask 261120   ;;  %s1759_s8 = smov 64   ;;  %s1760_s12 = smov 96  }
  0x97   : > { %1384 = vmatprep.subr.mxu1 %v1758_v1  ;;  %1386 = vmatprep.mubr.msk.f32.mxu1 %vm1757_vm0, %v1758_v1  ;;  %v1436_v5 = vpack.c.bf16 %v334_v3, %v333_v2  ;;  %v1439_v7 = vpack.c.bf16 %v336_v6, %v335_v4  ;;  %v343_v8 = vld [vmem:[%s282_s16] sm:$0xff]  ;;  %s1761_s30 = smov 88   ;;  %s1762_s18 = smov 120   ;;  %vm432_vm2 = vcmask 64512   ;;  %v424_v21 = vld [vmem:[%s2025_s10] sm:$0x3] }
  0x98   : > { %v1327_v9 = vld [vmem:[%s2171_s3] ss:$0 sm:$0xff]  ;;  %s1763_s20 = smov 80   ;;  %s1764_s15 = smov 112   ;;  %v425_v22 = vunpack.c.0.s8 %v424_v21  ;;  %v338_v6 = vld [vmem:[#allocation8] sm:$0xff]  ;;  %vm1102_vm3 = vcmask 130048  }
  0x99   : > { %1437 = vmatpush3.bf16.msra.mxu0 %v1436_v5  ;;  %s1765_s17 = smov 72   ;;  %s1766_s14 = smov 104   ;;  %vm1104_vm4 = vcmask 195584  }
  0x9a   : > { %1438 = vmatprep.subr.bf16.mxu0 %v1756_v0  ;;  %v426_v23 = vcvt.s32.f32 %v425_v22  ;;  %s1767_s16 = smov 56   ;;  %s1768_s0 = smov 40  }
  0x9b   : > { %s1769_s29 = smov 48   ;;  %s1770_s7 = smov 8  }
  0x9c   : > { %v427_v24 = vsub.f32 1.0, %v426_v23  ;;  %s1771_s10 = smov 16   ;;  %s1772_s27 = smov 24  }
  0x9d   : > { %1440 = vmatpush3.bf16.msra.mxu0 %v1439_v7  ;;  %v339_v7 = vld [vmem:[#allocation8 + $0x8] sm:$0xff]  ;;  %p2197_p13 = scmp.ne.s32.totalorder %s2187_s9, 0 }
  0x9e   : > { %1404 = vmatprep.subr.mxu0 %v1758_v1  ;;  %v428_v25 = vmul.f32 -1e+10, %v427_v24 }
  0xa0   : > { %1382 = vmatmul.mubr.msk.f32.vlgmr.msra.gmra.mrb[0].mxu0 %vm350_vm1, %v343_v8 }
  0xa1   : > { %1406 = vmatprep.mubr.msk.f32.mxu0 %vm1757_vm0, %v1758_v1 }
 0x173   : > { %v420_v10 = vpop.f32.mrb[0].mxu0 }
 0x174   : > { %v2053_v11 = vadd.f32 %v1327_v9, %v420_v10  ;;  %v1383_v12 = vpop.f32.mrb[1].mxu0  ;;  %v1442_v9 = vpack.c.bf16 %v339_v7, %v338_v6  ;;  %v340_v10 = vld [vmem:[#allocation8 + $0x10] sm:$0xff] }
 0x176   : > { %516 = vrot.lane.b32.xlu1 %v2053_v11, %s1759_s8  ;;  %430 = vrot.lane.b32.xlu0 %v2053_v11, %s1760_s12  ;;  %s1344_s12 = sshll.u32 %s1830_s25, 7  ;;  %s1773_s25 = smov [#allocation10]  }
 0x17a   : > { %596 = vrot.lane.b32.xlu1 %v2053_v11, %s1761_s30  ;;  %s332_s30 = scalar_lea.vmem [#allocation10], %s1322_s13  ;;  %s1674_s13 = sshll.u32 %s1773_s25, 4  ;;  %s1675_s13 = int_to_ptr.vmem [resolvable:$false] %s1674_s13 }
 0x17e   : > { %594 = vrot.lane.b32.xlu1 %v2053_v11, %s1762_s18  ;;  %s1200_s18 = sshll.u32 %s332_s30, 4  ;;  %s2126_s18 = int_to_ptr.vmem [resolvable:$true] %s1200_s18 }
 0x17f   : > { %p1677_p4 = scmp.lt.s32.totalorder %s2126_s18, %s1675_s13 }
 0x182   : > { %761 = vrot.lane.b32.xlu1 %v2053_v11, %s1763_s20 }
 0x186   : > { %759 = vrot.lane.b32.xlu1 %v2053_v11, %s1764_s15 }
 0x18a   : > { %926 = vrot.lane.b32.xlu1 %v2053_v11, %s1765_s17  ;;  %s2124_s17 = scalar_lea.hbm %s2174_s6, %s1344_s12 }
 0x18e   : > { %924 = vrot.lane.b32.xlu1 %v2053_v11, %s1766_s14  ;;  %s1187_s14 = scalar_lea.sflag [#allocation4], %s2013_s2 }
 0x1e8   : > { %v517_v13 = vpop.permute.xlu1 %516  ;;  %v431_v14 = vpop.permute.xlu0 %430 }
 0x1e9   : > { %1385 = vmatpush3.xpose.msk.msra.mxu1 %vm432_vm2, %v431_v14 }
 0x1ea   : > { %1389 = vmatprep.subr.mxu1 %v1758_v1 }
 0x1ec   : > { %v597_v15 = vpop.permute.xlu1 %596  ;;  %1387 = vmatmul.mubr.msk.f32.vlgmr.msra.gmra.mrb[0].mxu1 %vm432_vm2, %v2053_v11 }
 0x1ed   : > { %1390 = vmatpush3.msra.mxu1 %v517_v13  ;;  %1391 = vmatprep.mubr.msk.f32.mxu1 %vm1757_vm0, %v1758_v1 }
 0x1ee   : > { %1394 = vmatprep.subr.mxu1 %v1758_v1 }
 0x1f0   : > { %v595_v16 = vpop.permute.xlu1 %594 }
 0x1f4   : > { %v762_v17 = vpop.permute.xlu1 %761 }
 0x1f5   : > { %1405 = vmatpush3.xpose.msk.msra.mxu0 %vm432_vm2, %v762_v17 }
 0x1f6   : > { %1414 = vmatprep.subr.mxu0 %v1758_v1 }
 0x1f8   : > { %v760_v18 = vpop.permute.xlu1 %759 }
 0x1f9   : > { %1407 = vmatmul.mubr.msk.f32.vlgmr.msra.gmra.mrb[2].mxu0 %vm432_vm2, %v760_v18 }
 0x1fa   : > { %1416 = vmatprep.mubr.msk.f32.mxu0 %vm1757_vm0, %v1758_v1 }
 0x1fc   : > { %v927_v19 = vpop.permute.xlu1 %926 }
 0x1fd   : > { %1415 = vmatpush3.xpose.msk.msra.mxu0 %vm432_vm2, %v927_v19 }
 0x1fe   : > { %1441 = vmatprep.subr.bf16.mxu0 %v1756_v0 }
 0x200   : > { %v925_v20 = vpop.permute.xlu1 %924 }
 0x201   : > { %1417 = vmatmul.mubr.msk.f32.vlgmr.msra.gmra.mrb[4].mxu0 %vm432_vm2, %v925_v20 }
 0x202   : > { %1432 = vmatprep.mubr.msk.f32.mxu0 %vm1757_vm0, %v1758_v1  ;;  %1443 = vmatpush3.bf16.msra.mxu0 %v1442_v9 }
 0x203   : > { %1444 = vmatprep.subr.bf16.mxu0 %v1756_v0 }
 0x2bf   : > { %v503_v26 = vpop.f32.mrb[0].mxu1 }
 0x2c0   : > { %v504_v27 = vadd.f32 %v503_v26, %v428_v25  ;;  %v1388_v28 = vpop.f32.mrb[1].mxu1 }
 0x2c2   : > { %v507_v29 = vsel %vm432_vm2, %v504_v27, -inf }
 0x2c3   : > { %508 = vmax.xlane.f32.xlu0 %v507_v29 }
 0x2cc   : > { %v833_v30 = vpop.f32.mrb[2].mxu0 }
 0x2cd   : > { %v1408_v31 = vpop.f32.mrb[3].mxu0  ;;  %v834_v34 = vadd.f32 %v833_v30, %v428_v25 }
 0x2cf   : > { %v837_v36 = vsel %vm432_vm2, %v834_v34, -inf }
 0x2d4   : > { %v998_v32 = vpop.f32.mrb[4].mxu0 }
 0x2d5   : > { %v1418_v33 = vpop.f32.mrb[5].mxu0  ;;  %v999_v35 = vadd.f32 %v998_v32, %v428_v25 }
 0x2d6   : > { %v1341_v33 = vld [vmem:[%s2173_s5] ss:$0 sm:$0xff] }
 0x2d7   : > { %v1002_v37 = vsel %vm432_vm2, %v999_v35, -inf }
 0x2d9   : > { %681 = vrot.lane.b32.xlu0 %v2053_v11, %s1767_s16  ;;  %s1670_s16 = scalar_lea.vmem %s2126_s18, 128 }
 0x2da   : > { %p1671_p2 = scmp.ne.s32.totalorder %s2126_s18, %s1670_s16 }
 0x2dc   : > { %p1672_p6 = pnand %p1671_p2, %p2197_p13 }
 0x2de   : > { %p1673_p10 = pneg %p1672_p6 }
 0x2f8   : > { %838 = vmax.xlane.f32.xlu0 %v837_v36 }
 0x2fc   : > { %1003 = vmax.xlane.f32.xlu0 %v1002_v37 }
 0x312   : > { %1011 = vrot.lane.b32.xlu0 %v2053_v11, %s1768_s0  ;;  %s1676_s0 = scalar_lea.vmem %s1675_s13, 256 }
 0x313   : > { %p1678_p5 = scmp.lt.s32.totalorder %s1676_s0, %s1670_s16 }
 0x315   : > { %p1679_p3 = por %p1678_p5, %p1677_p4 }
 0x317   : > { %p1680_p7 = pnand %p1679_p3, %p1673_p10 }
 0x350   : > { %v509_v38 = vpop.xlane.xlu0 %508 }
 0x351   : > { %v510_v39 = vsub.f32 %v504_v27, %v509_v38 }
 0x353   : > { %v511_v40 = vmul.f32 1.442695, %v510_v39 }
 0x354   : > { %v682_v42 = vpop.permute.xlu0 %681 }
 0x355   : > { %1538 = vpow2.f32 %v511_v40 }
 0x35f   : > { %v1539_v41 = vpop.eup %1538 }
 0x360   : > { %1392 = vmatmul.mubr.msk.f32.vlgmr.msra.gmra.mrb[2].mxu1 %vm432_vm2, %v1539_v41  ;;  %v513_v4 = vsel %vm432_vm2, %v1539_v41, 0.0 }
 0x361   : > { %1395 = vmatpush3.xpose.msk.msra.mxu1 %vm432_vm2, %v597_v15  ;;  %1396 = vmatprep.mubr.msk.f32.mxu1 %vm1757_vm0, %v1758_v1 }
 0x362   : > { %1399 = vmatprep.subr.mxu1 %v1758_v1 }
 0x364   : > { %1397 = vmatmul.mubr.msk.f32.vlgmr.msra.gmra.mrb[4].mxu1 %vm432_vm2, %v595_v16 }
 0x365   : > { %1400 = vmatpush3.msra.mxu1 %v682_v42  ;;  %1401 = vmatprep.mubr.msk.f32.mxu1 %vm1757_vm0, %v1758_v1 }
 0x366   : > { %1409 = vmatprep.subr.mxu1 %v1758_v1 }
 0x385   : > { %v839_v49 = vpop.xlane.xlu0 %838 }
 0x386   : > { %v840_v50 = vsub.f32 %v834_v34, %v839_v49 }
 0x388   : > { %v841_v51 = vmul.f32 1.442695, %v840_v50 }
 0x389   : > { %v1004_v54 = vpop.xlane.xlu0 %1003 }
 0x38a   : > { %1540 = vpow2.f32 %v841_v51  ;;  %v1005_v55 = vsub.f32 %v999_v35, %v1004_v54 }
 0x38c   : > { %v1006_v58 = vmul.f32 1.442695, %v1005_v55 }
 0x38d   : > { %v1012_v2 = vpop.permute.xlu0 %1011 }
 0x394   : > { %v1541_v52 = vpop.eup %1540 }
 0x395   : > { %v843_v53 = vsel %vm432_vm2, %v1541_v52, 0.0 }
 0x433   : > { %v2095_v43 = vpop.f32.mrb[2].mxu1 }
 0x434   : > { %v1393_v44 = vpop.f32.mrb[3].mxu1 }
 0x437   : > { %v668_v45 = vpop.f32.mrb[4].mxu1 }
 0x438   : > { %v669_v46 = vadd.f32 %v668_v45, %v428_v25  ;;  %v1398_v47 = vpop.f32.mrb[5].mxu1 }
 0x43a   : > { %v672_v48 = vsel %vm432_vm2, %v669_v46, -inf }
 0x43b   : > { %673 = vmax.xlane.f32.xlu1 %v672_v48 }
 0x44c   : > { %846 = vrot.lane.b32.xlu1 %v2053_v11, %s1769_s29  ;;  %v341_v11 = vld [vmem:[#allocation8 + $0x18] sm:$0xff] }
 0x44d   : > { %v1445_v13 = vpack.c.bf16 %v341_v11, %v340_v10 }
 0x44f   : > { %1446 = vmatpush3.bf16.msra.mxu0 %v1445_v13 }
 0x470   : > { %844 = vadd.xlane.f32.xlu1 %v843_v53 }
 0x4c8   : > { %v674_v56 = vpop.xlane.xlu1 %673 }
 0x4c9   : > { %v675_v57 = vsub.f32 %v669_v46, %v674_v56 }
 0x4cb   : > { %v676_v59 = vmul.f32 1.442695, %v675_v57 }
 0x4cc   : > { %v847_v61 = vpop.permute.xlu1 %846 }
 0x4cd   : > { %1542 = vpow2.f32 %v676_v59 }
 0x4ce   : > { %1544 = vpow2.f32 %v1006_v58 }
 0x4d7   : > { %v1543_v60 = vpop.eup %1542 }
 0x4d8   : > { %1402 = vmatmul.mubr.msk.f32.vlgmr.msra.gmra.mrb[6].mxu1 %vm432_vm2, %v1543_v60  ;;  %v678_v62 = vsel %vm432_vm2, %v1543_v60, 0.0  ;;  %v1545_v63 = vpop.eup %1544 }
 0x4d9   : > { %1410 = vmatpush3.msra.mxu1 %v847_v61  ;;  %679 = vadd.xlane.f32.xlu0 %v678_v62  ;;  %v1008_v3 = vsel %vm432_vm2, %v1545_v63, 0.0 }
 0x4da   : > { %1411 = vmatprep.mubr.msk.f32.mxu1 %vm1757_vm0, %v1758_v1  ;;  %1419 = vmatprep.subr.mxu1 %v1758_v1 }
 0x4dc   : > { %1412 = vmatmul.mubr.msk.f32.vlgmr.msra.gmra.mrb[8].mxu1 %vm432_vm2, %v1541_v52 }
 0x4dd   : > { %1420 = vmatpush3.msra.mxu1 %v1012_v2  ;;  %1009 = vadd.xlane.f32.xlu0 %v1008_v3 }
 0x4de   : > { %1421 = vmatprep.mubr.msk.f32.mxu1 %vm1757_vm0, %v1758_v1 }
 0x4e0   : > { %1422 = vmatmul.mubr.msk.f32.vlgmr.msra.gmra.mrb[10].mxu1 %vm432_vm2, %v1545_v63 }
 0x4e1   : > { %514 = vadd.xlane.f32.xlu0 %v513_v4 }
 0x4fd   : > { %v845_v8 = vpop.xlane.xlu1 %844 }
 0x566   : > { %v680_v5 = vpop.xlane.xlu0 %679 }
 0x567   : > { %1546 = vrcp.f32 %v680_v5 }
 0x568   : > { %1548 = vrcp.f32 %v845_v8 }
 0x56a   : > { %v1010_v12 = vpop.xlane.xlu0 %1009 }
 0x56b   : > { %1550 = vrcp.f32 %v1010_v12 }
 0x56e   : > { %v515_v24 = vpop.xlane.xlu0 %514 }
 0x56f   : > { %1552 = vrcp.f32 %v515_v24 }
 0x571   : > { %v1547_v1 = vpop.eup %1546 }
 0x572   : > { %v1549_v17 = vpop.eup %1548 }
 0x575   : > { %v1551_v21 = vpop.eup %1550 }
 0x579   : > { %v1553_v25 = vpop.eup %1552 }
 0x57a   : > { %v593_v27 = vmul.f32 %v1553_v25, %v2095_v43 }
 0x5ab   : > { %v753_v14 = vpop.f32.mrb[6].mxu1 }
 0x5ac   : > { %v758_v15 = vmul.f32 %v1547_v1, %v753_v14  ;;  %v1403_v16 = vpop.f32.mrb[7].mxu1 }
 0x5ae   : > { %1090 = vrot.lane.b32.xlu0 %v758_v15, %s1770_s7 }
 0x5af   : > { %v918_v18 = vpop.f32.mrb[8].mxu1 }
 0x5b0   : > { %v923_v19 = vmul.f32 %v1549_v17, %v918_v18  ;;  %v1413_v20 = vpop.f32.mrb[9].mxu1 }
 0x5b2   : > { %1094 = vrot.lane.b32.xlu1 %v923_v19, %s1771_s10 }
 0x5b3   : > { %v1083_v0 = vpop.f32.mrb[10].mxu1 }
 0x5b4   : > { %v1088_v22 = vmul.f32 %v1551_v21, %v1083_v0  ;;  %v1423_v23 = vpop.f32.mrb[11].mxu1 }
 0x5b6   : > { %1098 = vrot.lane.b32.xlu0 %v1088_v22, %s1772_s27 }
 0x620   : > { %v1091_v26 = vpop.permute.xlu0 %1090 }
 0x621   : > { %v1101_v29 = vsel %vm432_vm2, %v593_v27, %v1091_v26 }
 0x624   : > { %v1095_v28 = vpop.permute.xlu1 %1094 }
 0x625   : > { %v1103_v30 = vsel %vm1102_vm3, %v1101_v29, %v1095_v28 }
 0x628   : > { %v1099_v31 = vpop.permute.xlu0 %1098 }
 0x629   : > { %v1105_v32 = vsel %vm1104_vm4, %v1103_v30, %v1099_v31 }
 0x62a   : > { %1433 = vmatmul.mubr.msk.f32.vlgmr.msra.gmra.mrb[6].mxu0 %vm350_vm1, %v1105_v32 }
 0x6fd   : > { %v1181_v34 = vpop.f32.mrb[6].mxu0 }
 0x6fe   : > { %v1182_v35 = vadd.f32 %v1341_v33, %v1181_v34  ;;  %v1434_v36 = vpop.f32.mrb[7].mxu0 }
 0x700   : > { %1185 = vst [vmem:[%s332_s30] sm:$0xff] %v1182_v35 }
 0x701   : > { %1683 = shalt.err (!%p1680_p7)
}
 0x702   : > { %s1684_s2 = scalar_lea.hbm %s2124_s17, 128  ;;  %s1688_s10 = scalar_lea.hbm %s2174_s6, 256 }
 0x703   : > { %p1685_p1 = scmp.ne.s32.totalorder %s2124_s17, %s1684_s2  ;;  %p1689_p0 = scmp.lt.u32.totalorder %s2124_s17, %s2174_s6 }
 0x704   : > { %p1690_p9 = scmp.lt.u32.totalorder %s1688_s10, %s1684_s2  ;;  %p1692_p2 = scmp.lt.u32.totalorder %s1684_s2, %s2124_s17 }
 0x705   : > { %p1686_p8 = pnand %p1685_p1, %p2197_p13 }
 0x706   : > { %p1691_p12 = por %p1690_p9, %p1689_p0 }
 0x707   : > { %p1687_p11 = pneg %p1686_p8 }
 0x708   : > { %p1693_p6 = por %p1692_p2, %p1691_p12 }
 0x70a   : > { %p1694_p10 = pnand %p1693_p6, %p1687_p11 }
 0x70c   : > { %1697 = shalt.err (!%p1694_p10)
}
 0x70d   : > { %1459 = dma.vmem_to_hbm [thread:$0]  (%p2197_p13), %s2126_s18, 128, %s2124_s17, %s1187_s14  }
 0x70e PF: > { %s1212_s8 = sand.u32 1, %s1736_s21   ;;  %p2198_p4 = scmp.ne.s32.totalorder %s2182_s28, 0 }
 0x70f   : > { %p2199_p5 = scmp.ge.s32.totalorder %s1748_s24, 2  ;;  %s1213_s12 = scalar_lea.sflag [#allocation4], %s1212_s8 }
 0x711   : > { %p1476_p3 = pnand %p2199_p5, %p2198_p4 }
 0x713   : > { %1731 = dma.done.wait (!%p1476_p3), %s1213_s12, 128  }
 0x714   : > { %1733 = vsyncadd (!%p1476_p3), %s1213_s12, 4294967168  ;;  %p23_p7 = scmp.ge.s32.totalorder %s1919_s26, 4   ;;  %s2200_s21 = smov %s1740_s22 }
 0x715   : > { %s2201_s22 = smov %s1744_s23  ;;  %s2202_s23 = smov %s1935_s11 }
 0x716   : > { %s2203_s24 = smov %s1919_s26  ;;  %25 = sbr.rel (!%p23_p7) target bundleno = 11 (0xb), region = 110 }
 0x71d   :  { %1218 = vsyncpa [#allocation3], 1 }
 0x71e   :  { %1220 = vsyncpa [#allocation3 + $0x1], 1 }
 0x71f   :  { %1221 = vsyncpa [#allocation6], 1 }
 0x720   :  { %1223 = vsyncpa [#allocation6 + $0x1], 1 }
 0x721   :  { %1224 = vsyncpa [#allocation9], 1 }
 0x722   :  { %1225 = vsyncpa [#allocation4], 1 }
 0x723   :  { %1227 = vsyncpa [#allocation4 + $0x1], 1 }

</bundles_post_ra>
